<compile_context>
chip_gen: v6e
topology: v6e:2x2x1
jax: 0.10.0
libtpu: 0.0.40
codegen_flags: <defaults>
</compile_context>

<pallas_src>
import functools

import jax
import jax.numpy as jnp
from jax.experimental import pallas as pl
from jax.experimental.pallas import tpu as pltpu

IN_FEATURES = 411
LATENT_DIM = 32
PRED_FEATURES = 6717

SUBLANE = 8
LANE = 128
IN_PAD = 512                      # ceil(411 / 128) * 128
PRED_PAD = 6784                   # ceil(6717 / 128) * 128 = 53 * 128
CAT_PAD = IN_PAD + PRED_PAD       # 7296 -> fused dec+pred output width


def _round_up(n, m):
    return ((n + m - 1) // m) * m


# ---------------------------------------------------------------------------
# Kernel
# ---------------------------------------------------------------------------
def sae_kernel(x_ref, ew_ref, eb_ref, cw_ref, cb_ref,
               xhat_ref, yhat_ref, z_ref):
    # x = x.to(float32) already done in wrapper; feed MXU with bf16 operands,
    # accumulate in fp32.
    x = x_ref[...].astype(jnp.bfloat16)

    # z = relu(enc(x))
    z = jnp.dot(x, ew_ref[...], preferred_element_type=jnp.float32) + eb_ref[...]
    z = jnp.maximum(z, 0.0)
    z_ref[...] = z                                     # latent returned in fp32

    # Fused dec + pred1: single matmul against concatenated (32, 512+6784)
    # weight, single bias-add + ReLU, then slice (slice boundary is lane-aligned).
    cat = jnp.dot(z.astype(jnp.bfloat16), cw_ref[...],
                  preferred_element_type=jnp.float32) + cb_ref[...]
    cat = jnp.maximum(cat, 0.0)
    xhat_ref[...] = cat[:, :IN_PAD]
    yhat_ref[...] = cat[:, IN_PAD:]


# ---------------------------------------------------------------------------
# Parameter preparation (pad to lane multiples, fuse dec+pred, cast to bf16)
# ---------------------------------------------------------------------------
def prepare_params(enc_w, enc_b, dec_w, dec_b, pred_w, pred_b):
    """Takes (in, out)-layout fp32 params; returns padded/fused kernel params."""
    # enc: pad K (411 -> 512) with zero rows; zeros do not change the dot.
    ew = (jnp.zeros((IN_PAD, LATENT_DIM), jnp.float32)
          .at[:IN_FEATURES, :].set(enc_w)).astype(jnp.bfloat16)
    eb = jnp.asarray(enc_b, jnp.float32).reshape(1, LATENT_DIM)

    # dec / pred1: pad output dims to 512 / 6784, concatenate along out dim.
    dw = jnp.zeros((LATENT_DIM, IN_PAD), jnp.float32).at[:, :IN_FEATURES].set(dec_w)
    pw = jnp.zeros((LATENT_DIM, PRED_PAD), jnp.float32).at[:, :PRED_FEATURES].set(pred_w)
    cw = jnp.concatenate([dw, pw], axis=1).astype(jnp.bfloat16)      # (32, 7296)

    db = jnp.zeros((1, IN_PAD), jnp.float32).at[:, :IN_FEATURES].set(
        jnp.asarray(dec_b, jnp.float32).reshape(1, -1))
    pb = jnp.zeros((1, PRED_PAD), jnp.float32).at[:, :PRED_FEATURES].set(
        jnp.asarray(pred_b, jnp.float32).reshape(1, -1))
    cb = jnp.concatenate([db, pb], axis=1)                           # (1, 7296)
    return ew, eb, cw, cb


# ---------------------------------------------------------------------------
# Forward wrapper
# ---------------------------------------------------------------------------
@functools.partial(jax.jit, static_argnames=("tb",))
def sparse_autoencoder_forward(x, ew, eb, cw, cb, *, tb=None):
    B = x.shape[0]
    if tb is None:
        # TB <= 128 keeps double-buffered tiles under v5e's 16 MiB default
        # scoped VMEM; raise to 256 (v7x) / 512 (v6e) for large batches.
        tb = min(128, _round_up(B, SUBLANE))
    B_pad = _round_up(max(B, 1), tb)
    grid = (B_pad // tb,)

    x = x.astype(jnp.float32)
    x_p = jnp.zeros((B_pad, IN_PAD), jnp.float32).at[:B, :IN_FEATURES].set(x)

    batch_spec = lambda n: pl.BlockSpec((tb, n), lambda i: (i, 0))
    const_spec = lambda shape: pl.BlockSpec(shape, lambda i: (0, 0))

    out_shape = (
        jax.ShapeDtypeStruct((B_pad, IN_PAD), jnp.float32),     # x_hat (padded)
        jax.ShapeDtypeStruct((B_pad, PRED_PAD), jnp.float32),   # y_hat (padded)
        jax.ShapeDtypeStruct((B_pad, LATENT_DIM), jnp.float32), # z
    )

    cost = pl.CostEstimate(
        flops=2 * B_pad * (IN_PAD * LATENT_DIM + LATENT_DIM * CAT_PAD),
        transcendentals=0,
        bytes_accessed=(x_p.size * 4 + ew.size * 2 + cw.size * 2
                        + eb.size * 4 + cb.size * 4
                        + B_pad * (IN_PAD + PRED_PAD + LATENT_DIM) * 4),
    )

    xhat_p, yhat_p, z_p = pl.pallas_call(
        sae_kernel,
        out_shape=out_shape,
        grid=grid,
        in_specs=[
            batch_spec(IN_PAD),                    # x tile
            const_spec((IN_PAD, LATENT_DIM)),      # enc W  (bf16, VMEM-resident)
            const_spec((1, LATENT_DIM)),           # enc b
            const_spec((LATENT_DIM, CAT_PAD)),     # fused dec+pred W (bf16)
            const_spec((1, CAT_PAD)),              # fused bias
        ],
        out_specs=(
            batch_spec(IN_PAD),
            batch_spec(PRED_PAD),
            batch_spec(LATENT_DIM),
        ),
        compiler_params=pltpu.CompilerParams(
            dimension_semantics=("parallel",),
            vmem_limit_bytes=32 << 20,
        ),
        cost_estimate=cost,
    )(x_p, ew, eb, cw, cb)

    return (xhat_p[:B, :IN_FEATURES],
            yhat_p[:B, :PRED_FEATURES],
            z_p[:B, :LATENT_DIM])


# ---------------------------------------------------------------------------
# Init + reference
# ---------------------------------------------------------------------------
def init_params(key):
    """PyTorch-Linear-style uniform(+-1/sqrt(fan_in)); weights stored (in, out)."""
    k = jax.random.split(key, 6)

    def lin(kw, kb, fan_in, fan_out):
        bound = 1.0 / jnp.sqrt(jnp.float32(fan_in))
        w = jax.random.uniform(kw, (fan_in, fan_out), jnp.float32, -bound, bound)
        b = jax.random.uniform(kb, (1, fan_out), jnp.float32, -bound, bound)
        return w, b

    enc_w, enc_b = lin(k[0], k[1], IN_FEATURES, LATENT_DIM)
    dec_w, dec_b = lin(k[2], k[3], LATENT_DIM, IN_FEATURES)
    pred_w, pred_b = lin(k[4], k[5], LATENT_DIM, PRED_FEATURES)
    return enc_w, enc_b, dec_w, dec_b, pred_w, pred_b


def reference_forward(x, enc_w, enc_b, dec_w, dec_b, pred_w, pred_b):
    x = x.astype(jnp.float32)
    z = jax.nn.relu(x @ enc_w + enc_b)
    y_hat = jax.nn.relu(z @ pred_w + pred_b)
    x_hat = jax.nn.relu(z @ dec_w + dec_b)
    return x_hat, y_hat, z


# ---------------------------------------------------------------------------
if __name__ == "__main__":
    key = jax.random.PRNGKey(0)
    k_params, k_x, k_x2 = jax.random.split(key, 3)

    enc_w, enc_b, dec_w, dec_b, pred_w, pred_b = init_params(k_params)
    kernel_params = prepare_params(enc_w, enc_b, dec_w, dec_b, pred_w, pred_b)

    # Reference uses the same bf16-quantized weights the kernel consumes, so
    # the check isolates kernel correctness from the deliberate bf16 cast.
    q = lambda w: w.astype(jnp.bfloat16).astype(jnp.float32)
    ref_params = (q(enc_w), enc_b, q(dec_w), dec_b, q(pred_w), pred_b)

    def check(B, xk):
        x = jax.random.normal(xk, (B, IN_FEATURES), dtype=jnp.float32)
        x_hat, y_hat, z = sparse_autoencoder_forward(x, *kernel_params)
        jax.block_until_ready((x_hat, y_hat, z))

        x_hat_r, y_hat_r, z_r = reference_forward(x, *ref_params)
        assert x_hat.shape == (B, IN_FEATURES)
        assert y_hat.shape == (B, PRED_FEATURES)
        assert z.shape == (B, LATENT_DIM)
        assert jnp.allclose(z, z_r, rtol=2e-2, atol=2e-2)
        assert jnp.allclose(x_hat, x_hat_r, rtol=2e-2, atol=2e-2)
        assert jnp.allclose(y_hat, y_hat_r, rtol=2e-2, atol=2e-2)

    # Small batch consistent with the module's (B, 411) input (single tile).
    check(8, k_x)
    # Larger, non-multiple batch to exercise the batch grid + padding path.
    check(200, k_x2)

    print("KERNEL_OK")
</pallas_src>

<mosaic_0001>
module attributes {stable_mosaic.version = 11 : i64} {
  func.func @sae_kernel(%arg0: i32, %arg1: memref<8x512xf32, #tpu.memory_space<vmem>>, %arg2: memref<512x32xbf16, #tpu.memory_space<vmem>>, %arg3: memref<1x32xf32, #tpu.memory_space<vmem>>, %arg4: memref<32x7296xbf16, #tpu.memory_space<vmem>>, %arg5: memref<1x7296xf32, #tpu.memory_space<vmem>>, %arg6: memref<8x512xf32, #tpu.memory_space<vmem>>, %arg7: memref<8x6784xf32, #tpu.memory_space<vmem>>, %arg8: memref<8x32xf32, #tpu.memory_space<vmem>>) attributes {dimension_semantics = [#tpu.dimension_semantics<parallel>], iteration_bounds = array<i64: 1>, scalar_prefetch = 0 : i64, scratch_operands = 0 : i64, tpu.core_type = #tpu.core_type<tc>, window_params = [{transform_indices = @transform_0, window_bounds = array<i64: 8, 512>}, {pipeline_mode = #tpu.pipeline_mode<synchronous>, transform_indices = @transform_1, window_bounds = array<i64: 512, 32>}, {pipeline_mode = #tpu.pipeline_mode<synchronous>, transform_indices = @transform_2, window_bounds = array<i64: 1, 32>}, {pipeline_mode = #tpu.pipeline_mode<synchronous>, transform_indices = @transform_3, window_bounds = array<i64: 32, 7296>}, {pipeline_mode = #tpu.pipeline_mode<synchronous>, transform_indices = @transform_4, window_bounds = array<i64: 1, 7296>}, {transform_indices = @transform_5, window_bounds = array<i64: 8, 512>}, {transform_indices = @transform_6, window_bounds = array<i64: 8, 6784>}, {transform_indices = @transform_7, window_bounds = array<i64: 8, 32>}]} {
    %c0 = arith.constant 0 : index
    %c0_0 = arith.constant 0 : index
    %0 = vector.load %arg1[%c0, %c0_0] : memref<8x512xf32, #tpu.memory_space<vmem>>, vector<8x512xf32>
    %1 = arith.truncf %0 : vector<8x512xf32> to vector<8x512xbf16>
    %c0_1 = arith.constant 0 : index
    %c0_2 = arith.constant 0 : index
    %2 = vector.load %arg2[%c0_1, %c0_2] : memref<512x32xbf16, #tpu.memory_space<vmem>>, vector<512x32xbf16>
    %cst = arith.constant dense<0.000000e+00> : vector<8x32xf32>
    %3 = tpu.matmul %1, %2, %cst {dimension_numbers = #tpu.dot_dimension_numbers<[1], [0], [0], [1], [0, 0, 1, 1], [], []>} : vector<8x512xbf16>, vector<512x32xbf16>, vector<8x32xf32> -> vector<8x32xf32>
    %c0_3 = arith.constant 0 : index
    %c0_4 = arith.constant 0 : index
    %4 = vector.load %arg3[%c0_3, %c0_4] : memref<1x32xf32, #tpu.memory_space<vmem>>, vector<1x32xf32>
    %5 = vector.broadcast %4 : vector<1x32xf32> to vector<8x32xf32>
    %6 = arith.addf %3, %5 : vector<8x32xf32>
    %cst_5 = arith.constant 0.000000e+00 : f32
    %7 = vector.broadcast %cst_5 : f32 to vector<8x32xf32>
    %8 = arith.maximumf %6, %7 : vector<8x32xf32>
    %c0_6 = arith.constant 0 : index
    %c0_7 = arith.constant 0 : index
    %9 = vector.load %arg8[%c0_6, %c0_7] : memref<8x32xf32, #tpu.memory_space<vmem>>, vector<8x32xf32>
    tpu.vector_store %arg8[%c0_6, %c0_7], %8 {strides = array<i32>} : memref<8x32xf32, #tpu.memory_space<vmem>>, vector<8x32xf32>,
    %10 = arith.truncf %8 : vector<8x32xf32> to vector<8x32xbf16>
    %c0_8 = arith.constant 0 : index
    %c0_9 = arith.constant 0 : index
    %11 = vector.load %arg4[%c0_8, %c0_9] : memref<32x7296xbf16, #tpu.memory_space<vmem>>, vector<32x7296xbf16>
    %cst_10 = arith.constant dense<0.000000e+00> : vector<8x7296xf32>
    %12 = tpu.matmul %10, %11, %cst_10 {dimension_numbers = #tpu.dot_dimension_numbers<[1], [0], [0], [1], [0, 0, 1, 1], [], []>} : vector<8x32xbf16>, vector<32x7296xbf16>, vector<8x7296xf32> -> vector<8x7296xf32>
    %c0_11 = arith.constant 0 : index
    %c0_12 = arith.constant 0 : index
    %13 = vector.load %arg5[%c0_11, %c0_12] : memref<1x7296xf32, #tpu.memory_space<vmem>>, vector<1x7296xf32>
    %14 = vector.broadcast %13 : vector<1x7296xf32> to vector<8x7296xf32>
    %15 = arith.addf %12, %14 : vector<8x7296xf32>
    %cst_13 = arith.constant 0.000000e+00 : f32
    %16 = vector.broadcast %cst_13 : f32 to vector<8x7296xf32>
    %17 = arith.maximumf %15, %16 : vector<8x7296xf32>
    %18 = vector.extract_strided_slice %17 {offsets = [0, 0], sizes = [8, 512], strides = [1, 1]} : vector<8x7296xf32> to vector<8x512xf32>
    %c0_14 = arith.constant 0 : index
    %c0_15 = arith.constant 0 : index
    %19 = vector.load %arg6[%c0_14, %c0_15] : memref<8x512xf32, #tpu.memory_space<vmem>>, vector<8x512xf32>
    tpu.vector_store %arg6[%c0_14, %c0_15], %18 {strides = array<i32>} : memref<8x512xf32, #tpu.memory_space<vmem>>, vector<8x512xf32>,
    %20 = vector.extract_strided_slice %17 {offsets = [0, 512], sizes = [8, 6784], strides = [1, 1]} : vector<8x7296xf32> to vector<8x6784xf32>
    %c0_16 = arith.constant 0 : index
    %c0_17 = arith.constant 0 : index
    %21 = vector.load %arg7[%c0_16, %c0_17] : memref<8x6784xf32, #tpu.memory_space<vmem>>, vector<8x6784xf32>
    tpu.vector_store %arg7[%c0_16, %c0_17], %20 {strides = array<i32>} : memref<8x6784xf32, #tpu.memory_space<vmem>>, vector<8x6784xf32>,
    return
  }
  func.func @transform_0(%arg0: i32) -> (i32, i32) {
    %c0_i32 = arith.constant 0 : i32
    %c0_i32_0 = arith.constant 0 : i32
    return %arg0, %c0_i32 : i32, i32
  }
  func.func @transform_1(%arg0: i32) -> (i32, i32) {
    %c0_i32 = arith.constant 0 : i32
    %c0_i32_0 = arith.constant 0 : i32
    %c0_i32_1 = arith.constant 0 : i32
    return %c0_i32, %c0_i32_0 : i32, i32
  }
  func.func @transform_2(%arg0: i32) -> (i32, i32) {
    %c0_i32 = arith.constant 0 : i32
    %c0_i32_0 = arith.constant 0 : i32
    %c0_i32_1 = arith.constant 0 : i32
    return %c0_i32, %c0_i32_0 : i32, i32
  }
  func.func @transform_3(%arg0: i32) -> (i32, i32) {
    %c0_i32 = arith.constant 0 : i32
    %c0_i32_0 = arith.constant 0 : i32
    %c0_i32_1 = arith.constant 0 : i32
    return %c0_i32, %c0_i32_0 : i32, i32
  }
  func.func @transform_4(%arg0: i32) -> (i32, i32) {
    %c0_i32 = arith.constant 0 : i32
    %c0_i32_0 = arith.constant 0 : i32
    %c0_i32_1 = arith.constant 0 : i32
    return %c0_i32, %c0_i32_0 : i32, i32
  }
  func.func @transform_5(%arg0: i32) -> (i32, i32) {
    %c0_i32 = arith.constant 0 : i32
    %c0_i32_0 = arith.constant 0 : i32
    return %arg0, %c0_i32 : i32, i32
  }
  func.func @transform_6(%arg0: i32) -> (i32, i32) {
    %c0_i32 = arith.constant 0 : i32
    %c0_i32_0 = arith.constant 0 : i32
    return %arg0, %c0_i32 : i32, i32
  }
  func.func @transform_7(%arg0: i32) -> (i32, i32) {
    %c0_i32 = arith.constant 0 : i32
    %c0_i32_0 = arith.constant 0 : i32
    return %arg0, %c0_i32 : i32, i32
  }
}

</mosaic_0001>

<bundles_post_ra>
// kernel: sparse_autoencoder_forward.1
= control target key start
LH: loop header
LB: loop body
LE: loop exit
PB: predicated region body
PF: predicated region fallthrough
CT: control target
= control target key end

     0   :  { %13 = vsyncpa [#allocation3], 0  ;;  %s3617_s0 = inlined_call_operand.vmem [shape: f32[8,512], index: 0, kind: input, shape index: {}]   ;;  %s3618_s1 = inlined_call_operand.vmem [shape: bf16[512,32], index: 1, kind: input, shape index: {}]   ;;  %s3619_s2 = inlined_call_operand.vmem [shape: f32[1,32], index: 2, kind: input, shape index: {}]   ;;  %s3620_s3 = inlined_call_operand.hbm [shape: bf16[32,7296], index: 3, kind: input, shape index: {}]   ;;  %s3621_s4 = inlined_call_operand.vmem [shape: f32[1,7296], index: 4, kind: input, shape index: {}]   ;;  %s3622_s5 = inlined_call_operand.hbm [shape: f32[8,512], index: 5, kind: output, shape index: {0}]   ;;  %s3623_s6 = inlined_call_operand.hbm [shape: f32[8,6784], index: 6, kind: output, shape index: {1}]   ;;  %s3624_s7 = inlined_call_operand.hbm [shape: f32[8,32], index: 7, kind: output, shape index: {2}]  }
   0x1   :  { %14 = vsyncpa [#allocation4], 0 }
   0x2   :  { %15 = vsyncpa [#allocation7], 0  ;;  %s3260_s24 = smov [#allocation2]  }
   0x3   :  { %s27_s25 = sshll.u32 %s3260_s24, 4  ;;  %s28_s25 = int_to_ptr.vmem [resolvable:$true] %s27_s25 }
   0x4   :  { %s3182_s26 = scalar_lea.vmem %s28_s25, 14592  ;;  %p3187_p1 = scmp.lt.s32.totalorder %s28_s25, %s28_s25 }
   0x5   :  { %p3183_p0 = scmp.ne.s32.totalorder %s28_s25, %s3182_s26  ;;  %p3188_p2 = scmp.lt.s32.totalorder %s3182_s26, %s3182_s26 }
   0x7   :  { %p3189_p3 = por %p3188_p2, %p3187_p1 }
   0x9   :  { %p3190_p4 = pnand %p3189_p3, %p3183_p0 }
   0xb   :  { %3193 = shalt.err (!%p3190_p4)
}
   0xc   :  { %s3261_s27 = smov 3648   ;;  %s3262_s28 = smov 228  }
   0xd   :  { %33 = dma.hbm_to_vmem [thread:$0]  %s3620_s3, 14592, %s28_s25, [#allocation3], %s3261_s27, %s3261_s27, %s3262_s28  }
   0xe   :  { %3254 = dma.done.wait [#allocation3], 14592  }
   0xf   :  { %3255 = vsyncadd [#allocation3], 4294952704  ;;  %v2972_v0 = vld [vmem:[%s3618_s1 + $0x78] sm:$0xff]   ;;  %v2976_v4 = vld [vmem:[%s3618_s1 + $0x70] sm:$0xff]   ;;  %v3263_v49 = vmov 0   ;;  %vm392_vm0 = vcmask 261120  }
  0x10   :  { %v2973_v1 = vld [vmem:[%s3618_s1 + $0xf8] sm:$0xff]   ;;  %2908 = vmatprep.subr.bf16.mxu0 %v2972_v0  ;;  %v2977_v5 = vld [vmem:[%s3618_s1 + $0xf0] sm:$0xff]   ;;  %v2980_v8 = vld [vmem:[%s3618_s1 + $0x68] sm:$0xff]   ;;  %vm3265_vm1 = vmmov 0   ;;  %s3266_s9 = smov [#allocation5]  }
  0x11   :  { %v2974_v2 = vld [vmem:[%s3618_s1 + $0x38] sm:$0xff]   ;;  %2930 = vmatprep.subr.bf16.mxu1 %v2973_v1  ;;  %v2978_v6 = vld [vmem:[%s3618_s1 + $0x30] sm:$0xff]   ;;  %v2981_v9 = vld [vmem:[%s3618_s1 + $0xe8] sm:$0xff]   ;;  %s2695_s10 = sshll.u32 %s3266_s9, 4  ;;  %s2696_s10 = int_to_ptr.vmem [resolvable:$true] %s2695_s10 }
  0x12   :  { %v2975_v3 = vld [vmem:[%s3618_s1 + $0xb8] sm:$0xff]   ;;  %2909 = vmatpush3.bf16.msra.mxu0 %v2974_v2  ;;  %v2979_v7 = vld [vmem:[%s3618_s1 + $0xb0] sm:$0xff]   ;;  %v2982_v10 = vld [vmem:[%s3618_s1 + $0x28] sm:$0xff]   ;;  %s3194_s11 = scalar_lea.vmem %s2696_s10, 512  ;;  %p3199_p6 = scmp.lt.s32.totalorder %s2696_s10, %s2696_s10 }
  0x13   :  { %2931 = vmatpush3.bf16.msra.mxu1 %v2975_v3  ;;  %2910 = vmatprep.subr.bf16.mxu0 %v2976_v4  ;;  %v2983_v11 = vld [vmem:[%s3618_s1 + $0xa8] sm:$0xff]   ;;  %v2984_v12 = vld [vmem:[%s3618_s1 + $0x60] sm:$0xff]   ;;  %v2988_v16 = vld [vmem:[%s3618_s1 + $0x58] sm:$0xff]   ;;  %p3195_p5 = scmp.ne.s32.totalorder %s2696_s10, %s3194_s11  ;;  %p3200_p7 = scmp.lt.s32.totalorder %s3194_s11, %s3194_s11 }
  0x14   :  { %2932 = vmatprep.subr.bf16.mxu1 %v2977_v5  ;;  %v2985_v13 = vld [vmem:[%s3618_s1 + $0xe0] sm:$0xff]   ;;  %v2989_v17 = vld [vmem:[%s3618_s1 + $0xd8] sm:$0xff]   ;;  %v2992_v20 = vld [vmem:[%s3618_s1 + $0x50] sm:$0xff]  }
  0x15   :  { %v2986_v14 = vld [vmem:[%s3618_s1 + $0x20] sm:$0xff]   ;;  %v2990_v18 = vld [vmem:[%s3618_s1 + $0x18] sm:$0xff]   ;;  %v2993_v21 = vld [vmem:[%s3618_s1 + $0xd0] sm:$0xff]   ;;  %p3201_p8 = por %p3200_p7, %p3199_p6 }
  0x16   :  { %2911 = vmatpush3.bf16.msra.mxu0 %v2978_v6  ;;  %v2987_v15 = vld [vmem:[%s3618_s1 + $0xa0] sm:$0xff]   ;;  %v2991_v19 = vld [vmem:[%s3618_s1 + $0x98] sm:$0xff]   ;;  %v2994_v22 = vld [vmem:[%s3618_s1 + $0x10] sm:$0xff]  }
  0x17   :  { %2933 = vmatpush3.bf16.msra.mxu1 %v2979_v7  ;;  %2912 = vmatprep.subr.bf16.mxu0 %v2980_v8  ;;  %v2995_v23 = vld [vmem:[%s3618_s1 + $0x90] sm:$0xff]   ;;  %v2996_v24 = vld [vmem:[%s3618_s1 + $0x48] sm:$0xff]   ;;  %v3000_v28 = vld [vmem:[%s3618_s1 + $0x40] sm:$0xff]   ;;  %p3202_p9 = pnand %p3201_p8, %p3195_p5 }
  0x18   :  { %2934 = vmatprep.subr.bf16.mxu1 %v2981_v9  ;;  %v2997_v25 = vld [vmem:[%s3618_s1 + $0xc8] sm:$0xff]   ;;  %v3001_v29 = vld [vmem:[%s3618_s1 + $0xc0] sm:$0xff]   ;;  %v43_v33 = vld [vmem:[%s3617_s0 + $0x18] sm:$0xff] }
  0x19   :  { %v2998_v26 = vld [vmem:[%s3618_s1 + $0x8] sm:$0xff]   ;;  %v3002_v30 = vld [vmem:[%s3618_s1] sm:$0xff]   ;;  %v47_v36 = vpack.c.bf16 %v43_v33, %v43_v33  ;;  %v42_v38 = vld [vmem:[%s3617_s0 + $0x10] sm:$0xff] }
  0x1a   :  { %2913 = vmatpush3.bf16.msra.mxu0 %v2982_v10  ;;  %v2999_v27 = vld [vmem:[%s3618_s1 + $0x88] sm:$0xff]   ;;  %v3003_v31 = vld [vmem:[%s3618_s1 + $0x80] sm:$0xff]   ;;  %v46_v39 = vpack.c.bf16 %v42_v38, %v42_v38  ;;  %v3009_v41 = vld [vmem:[#allocation2 + $0x1d4] ss:$228 sps:$4 sm:$0xff]  }
  0x1b   :  { %2935 = vmatpush3.bf16.msra.mxu1 %v2983_v11  ;;  %2914 = vmatprep.subr.bf16.mxu0 %v2984_v12  ;;  %v41_v32 = vld [vmem:[%s3617_s0 + $0x8] sm:$0xff]  ;;  %v40_v34 = vld [vmem:[%s3617_s0] sm:$0xff]  ;;  %v3007_v43 = vld [vmem:[#allocation2 + $0x1d0] ss:$228 sps:$4 sm:$0xff]  }
  0x1c   :  { %2936 = vmatprep.subr.bf16.mxu1 %v2985_v13  ;;  %v45_v35 = vpack.c.bf16 %v41_v32, %v41_v32  ;;  %v44_v37 = vpack.c.bf16 %v40_v34, %v40_v34  ;;  %383 = vmatprep.mubr.bf16.mxu1 %v47_v36  ;;  %v3006_v40 = vld [vmem:[#allocation2 + $0x1cc] ss:$228 sps:$4 sm:$0xff]   ;;  %v3012_v44 = vld [vmem:[#allocation2 + $0x4] ss:$228 sps:$4 sm:$0xff]   ;;  %v3018_v48 = vld [vmem:[#allocation2 + $0x1dc] ss:$228 sps:$4 sm:$0xff]  }
  0x1d   :  { %v3004_v42 = vld [vmem:[#allocation2 + $0x1c8] ss:$228 sps:$4 sm:$0xff]   ;;  %v3010_v46 = vld [vmem:[#allocation2] ss:$228 sps:$4 sm:$0xff]   ;;  %v3016_v1 = vld [vmem:[#allocation2 + $0x1d8] ss:$228 sps:$4 sm:$0xff]  }
  0x1e   :  { %2915 = vmatpush3.bf16.msra.mxu0 %v2986_v14  ;;  %343 = vmatprep.mubr.bf16.mxu0 %v45_v35  ;;  %v3015_v45 = vld [vmem:[#allocation2 + $0xc] ss:$228 sps:$4 sm:$0xff]   ;;  %v3021_v50 = vld [vmem:[#allocation2 + $0x1e4] ss:$228 sps:$4 sm:$0xff]   ;;  %v2731_v53 = vld [vmem:[%s3619_s2] ss:$0 sm:$0xff] }
  0x1f   :  { %2937 = vmatpush3.bf16.msra.mxu1 %v2987_v15  ;;  %2916 = vmatprep.subr.bf16.mxu0 %v2988_v16  ;;  %v3013_v47 = vld [vmem:[#allocation2 + $0x8] ss:$228 sps:$4 sm:$0xff]   ;;  %v3019_v2 = vld [vmem:[#allocation2 + $0x1e0] ss:$228 sps:$4 sm:$0xff]   ;;  %v3024_v4 = vld [vmem:[#allocation2 + $0x14] ss:$228 sps:$4 sm:$0xff]  }
  0x20   :  { %2938 = vmatprep.subr.bf16.mxu1 %v2989_v17  ;;  %v3027_v5 = vld [vmem:[#allocation2 + $0x1c] ss:$228 sps:$4 sm:$0xff]   ;;  %v3022_v6 = vld [vmem:[#allocation2 + $0x10] ss:$228 sps:$4 sm:$0xff]   ;;  %v3028_v10 = vld [vmem:[#allocation2 + $0x1e8] ss:$228 sps:$4 sm:$0xff]  }
  0x21   :  { %v3025_v7 = vld [vmem:[#allocation2 + $0x18] ss:$228 sps:$4 sm:$0xff]   ;;  %v3030_v8 = vld [vmem:[#allocation2 + $0x1ec] ss:$228 sps:$4 sm:$0xff]   ;;  %v3036_v12 = vld [vmem:[#allocation2 + $0x24] ss:$228 sps:$4 sm:$0xff]  }
  0x22   :  { %2917 = vmatpush3.bf16.msra.mxu0 %v2990_v18  ;;  %v3033_v9 = vld [vmem:[#allocation2 + $0x1f4] ss:$228 sps:$4 sm:$0xff]   ;;  %v3039_v13 = vld [vmem:[#allocation2 + $0x2c] ss:$228 sps:$4 sm:$0xff]   ;;  %v3034_v14 = vld [vmem:[#allocation2 + $0x20] ss:$228 sps:$4 sm:$0xff]  }
  0x23   :  { %2939 = vmatpush3.bf16.msra.mxu1 %v2991_v19  ;;  %2918 = vmatprep.subr.bf16.mxu0 %v2992_v20  ;;  %v3031_v11 = vld [vmem:[#allocation2 + $0x1f0] ss:$228 sps:$4 sm:$0xff]   ;;  %v3037_v15 = vld [vmem:[#allocation2 + $0x28] ss:$228 sps:$4 sm:$0xff]   ;;  %v3042_v16 = vld [vmem:[#allocation2 + $0x1fc] ss:$228 sps:$4 sm:$0xff]  }
  0x24   :  { %2940 = vmatprep.subr.bf16.mxu1 %v2993_v21  ;;  %v3045_v17 = vld [vmem:[#allocation2 + $0x204] ss:$228 sps:$4 sm:$0xff]   ;;  %v3040_v18 = vld [vmem:[#allocation2 + $0x1f8] ss:$228 sps:$4 sm:$0xff]   ;;  %v3070_v38 = vld [vmem:[#allocation2 + $0x50] ss:$228 sps:$4 sm:$0xff]  }
  0x25   :  { %v3043_v19 = vld [vmem:[#allocation2 + $0x200] ss:$228 sps:$4 sm:$0xff]   ;;  %v3048_v20 = vld [vmem:[#allocation2 + $0x34] ss:$228 sps:$4 sm:$0xff]  }
  0x26   :  { %2919 = vmatpush3.bf16.msra.mxu0 %v2994_v22  ;;  %v3051_v21 = vld [vmem:[#allocation2 + $0x3c] ss:$228 sps:$4 sm:$0xff]   ;;  %v3046_v22 = vld [vmem:[#allocation2 + $0x30] ss:$228 sps:$4 sm:$0xff]   ;;  %v3069_v33 = vld [vmem:[#allocation2 + $0x224] ss:$228 sps:$4 sm:$0xff]  }
  0x27   :  { %2941 = vmatpush3.bf16.msra.mxu1 %v2995_v23  ;;  %2920 = vmatprep.subr.bf16.mxu0 %v2996_v24  ;;  %v3049_v23 = vld [vmem:[#allocation2 + $0x38] ss:$228 sps:$4 sm:$0xff]   ;;  %v3054_v24 = vld [vmem:[#allocation2 + $0x20c] ss:$228 sps:$4 sm:$0xff]   ;;  %v3067_v35 = vld [vmem:[#allocation2 + $0x220] ss:$228 sps:$4 sm:$0xff]  }
  0x28   :  { %2942 = vmatprep.subr.bf16.mxu1 %v2997_v25  ;;  %v3057_v25 = vld [vmem:[#allocation2 + $0x214] ss:$228 sps:$4 sm:$0xff]   ;;  %v3066_v32 = vld [vmem:[#allocation2 + $0x21c] ss:$228 sps:$4 sm:$0xff]  }
  0x29   :  { %v3064_v34 = vld [vmem:[#allocation2 + $0x218] ss:$228 sps:$4 sm:$0xff]  }
  0x2a   :  { %2921 = vmatpush3.bf16.msra.mxu0 %v2998_v26  ;;  %v3052_v26 = vld [vmem:[#allocation2 + $0x208] ss:$228 sps:$4 sm:$0xff]   ;;  %v3072_v36 = vld [vmem:[#allocation2 + $0x54] ss:$228 sps:$4 sm:$0xff]  }
  0x2b   :  { %2943 = vmatpush3.bf16.msra.mxu1 %v2999_v27  ;;  %2922 = vmatprep.subr.bf16.mxu0 %v3000_v28  ;;  %v3055_v27 = vld [vmem:[#allocation2 + $0x210] ss:$228 sps:$4 sm:$0xff]   ;;  %v3060_v28 = vld [vmem:[#allocation2 + $0x44] ss:$228 sps:$4 sm:$0xff]  }
  0x2c   :  { %2944 = vmatprep.subr.bf16.mxu1 %v3001_v29  ;;  %v3063_v29 = vld [vmem:[#allocation2 + $0x4c] ss:$228 sps:$4 sm:$0xff]  }
  0x2e   :  { %2923 = vmatpush3.bf16.msra.mxu0 %v3002_v30  ;;  %v3058_v30 = vld [vmem:[#allocation2 + $0x40] ss:$228 sps:$4 sm:$0xff]  }
  0x2f   :  { %2945 = vmatpush3.bf16.msra.mxu1 %v3003_v31  ;;  %1399 = vmatprep.subr.bf16.mxu0 %v3006_v40  ;;  %v3061_v31 = vld [vmem:[#allocation2 + $0x48] ss:$228 sps:$4 sm:$0xff]  }
  0x30   :  { %1440 = vmatprep.subr.bf16.mxu1 %v3009_v41  ;;  %v3078_v40 = vld [vmem:[#allocation2 + $0x22c] ss:$228 sps:$4 sm:$0xff]   ;;  %v3081_v41 = vld [vmem:[#allocation2 + $0x234] ss:$228 sps:$4 sm:$0xff]  }
  0x31   :  { %344 = vmatmul.mubr.bf16.vlgmr.msra.gmra.mxu0 %v44_v37  ;;  %v3075_v37 = vld [vmem:[#allocation2 + $0x5c] ss:$228 sps:$4 sm:$0xff]  }
  0x32   :  { %384 = vmatmul.mubr.bf16.vlgmr.msra.gmra.mxu1 %v46_v39  ;;  %1400 = vmatpush1.bf16.msra.mxu0 %v3004_v42  ;;  %v3073_v39 = vld [vmem:[#allocation2 + $0x58] ss:$228 sps:$4 sm:$0xff]   ;;  %v3076_v42 = vld [vmem:[#allocation2 + $0x228] ss:$228 sps:$4 sm:$0xff]  }
  0x33   :  { %1441 = vmatpush1.bf16.msra.mxu1 %v3007_v43  ;;  %1401 = vmatprep.subr.bf16.mxu0 %v3012_v44  ;;  %v3079_v43 = vld [vmem:[#allocation2 + $0x230] ss:$228 sps:$4 sm:$0xff]   ;;  %v3084_v44 = vld [vmem:[#allocation2 + $0x64] ss:$228 sps:$4 sm:$0xff]  }
  0x34   :  { %1442 = vmatprep.subr.bf16.mxu1 %v3015_v45  ;;  %1419 = vmatprep.mubr.bf16.mxu0 %v3263_v49  ;;  %v3087_v45 = vld [vmem:[#allocation2 + $0x6c] ss:$228 sps:$4 sm:$0xff]  }
  0x35   :  { %1460 = vmatprep.mubr.bf16.mxu1 %v3263_v49 }
  0x36   :  { %1402 = vmatpush1.bf16.msra.mxu0 %v3010_v46  ;;  %v3082_v46 = vld [vmem:[#allocation2 + $0x60] ss:$228 sps:$4 sm:$0xff]  }
  0x37   :  { %1443 = vmatpush1.bf16.msra.mxu1 %v3013_v47  ;;  %1481 = vmatprep.subr.bf16.mxu0 %v3018_v48  ;;  %v3085_v47 = vld [vmem:[#allocation2 + $0x68] ss:$228 sps:$4 sm:$0xff]   ;;  %v3090_v48 = vld [vmem:[#allocation2 + $0x23c] ss:$228 sps:$4 sm:$0xff]  }
  0x38   :  { %1522 = vmatprep.subr.bf16.mxu1 %v3021_v50  ;;  %v3093_v50 = vld [vmem:[#allocation2 + $0x244] ss:$228 sps:$4 sm:$0xff]  }
  0xf1   :  { %v2924_v51 = vpop.f32.mrf.mxu0 }
  0xf2   :  { %v2946_v52 = vpop.f32.mrf.mxu1 }
  0xf3   :  { %v2925_v54 = vpop.f32.mrf.mxu0 }
  0xf4   :  { %v2947_v55 = vpop.f32.mrf.mxu1  ;;  %v2926_v56 = vadd.f32 %v2925_v54, %v2924_v51  ;;  %v3088_v51 = vld [vmem:[#allocation2 + $0x238] ss:$228 sps:$4 sm:$0xff]  }
  0xf5   :  { %v2927_v57 = vpop.f32.mrf.mxu0  ;;  %v2948_v60 = vadd.f32 %v2947_v55, %v2946_v52  ;;  %v3091_v52 = vld [vmem:[#allocation2 + $0x240] ss:$228 sps:$4 sm:$0xff]   ;;  %v3094_v55 = vld [vmem:[#allocation2 + $0x70] ss:$228 sps:$4 sm:$0xff]  }
  0xf6   :  { %v2949_v58 = vpop.f32.mrf.mxu1  ;;  %v346_v59 = vadd.f32 %v2926_v56, %v2731_v53  ;;  %v3096_v53 = vld [vmem:[#allocation2 + $0x74] ss:$228 sps:$4 sm:$0xff]   ;;  %v3099_v54 = vld [vmem:[#allocation2 + $0x7c] ss:$228 sps:$4 sm:$0xff]   ;;  %v3102_v57 = vld [vmem:[#allocation2 + $0x24c] ss:$228 sps:$4 sm:$0xff]  }
  0xf7   :  { %v2928_v61 = vpop.f32.mrf.mxu0  ;;  %v3097_v56 = vld [vmem:[#allocation2 + $0x78] ss:$228 sps:$4 sm:$0xff]  }
  0xf8   :  { %v2950_v62 = vpop.f32.mrf.mxu1  ;;  %v386_v63 = vadd.f32 %v2948_v60, %v346_v59  ;;  %v3105_v58 = vld [vmem:[#allocation2 + $0x254] ss:$228 sps:$4 sm:$0xff]   ;;  %v3100_v59 = vld [vmem:[#allocation2 + $0x248] ss:$228 sps:$4 sm:$0xff]  }
  0xf9   :  { %v3103_v60 = vld [vmem:[#allocation2 + $0x250] ss:$228 sps:$4 sm:$0xff]   ;;  %v3108_v61 = vld [vmem:[#allocation2 + $0x84] ss:$228 sps:$4 sm:$0xff]  }
  0xfa   :  { %v391_v0 = vmax.f32 %v386_v63, 0.0  ;;  %v3111_v62 = vld [vmem:[#allocation2 + $0x8c] ss:$228 sps:$4 sm:$0xff]   ;;  %v3106_v63 = vld [vmem:[#allocation2 + $0x80] ss:$228 sps:$4 sm:$0xff]  }
  0xfc   :  { %v3425_v3 = vpack.c.bf16 %v391_v0, %v391_v0  ;;  %393 = vst.msk [vmem:[#allocation8] sm:$0xff] %vm392_vm0, %v391_v0  ;;  %v3109_v0 = vld [vmem:[#allocation2 + $0x88] ss:$228 sps:$4 sm:$0xff]  }
  0xfe   :  { %2879 = vmatmul.mubr.msk.bf16.vlgmr.msra.gmra.mxu0 %vm392_vm0, %v3425_v3  ;;  %2880 = vmatmul.mubr.msk.bf16.vlgmr.msra.gmra.mxu1 %vm392_vm0, %v3425_v3 }
  0xff   :  { %1482 = vmatpush1.bf16.msra.mxu0 %v3016_v1  ;;  %1523 = vmatpush1.bf16.msra.mxu1 %v3019_v2  ;;  %v3114_v1 = vld [vmem:[#allocation2 + $0x25c] ss:$228 sps:$4 sm:$0xff]   ;;  %v3117_v2 = vld [vmem:[#allocation2 + $0x264] ss:$228 sps:$4 sm:$0xff]  }
 0x100   :  { %1483 = vmatprep.subr.bf16.mxu0 %v3024_v4  ;;  %1524 = vmatprep.subr.bf16.mxu1 %v3027_v5  ;;  %v3112_v4 = vld [vmem:[#allocation2 + $0x258] ss:$228 sps:$4 sm:$0xff]   ;;  %v3115_v5 = vld [vmem:[#allocation2 + $0x260] ss:$228 sps:$4 sm:$0xff]  }
 0x101   :  { %1501 = vmatprep.mubr.bf16.mxu0 %v3263_v49  ;;  %1542 = vmatprep.mubr.bf16.mxu1 %v3263_v49 }
 0x103   :  { %1484 = vmatpush1.bf16.msra.mxu0 %v3022_v6  ;;  %1525 = vmatpush1.bf16.msra.mxu1 %v3025_v7  ;;  %v3120_v6 = vld [vmem:[#allocation2 + $0x94] ss:$228 sps:$4 sm:$0xff]   ;;  %v3123_v7 = vld [vmem:[#allocation2 + $0x9c] ss:$228 sps:$4 sm:$0xff]  }
 0x104   :  { %1563 = vmatprep.subr.bf16.mxu0 %v3030_v8  ;;  %1604 = vmatprep.subr.bf16.mxu1 %v3033_v9  ;;  %v3118_v8 = vld [vmem:[#allocation2 + $0x90] ss:$228 sps:$4 sm:$0xff]   ;;  %v3121_v9 = vld [vmem:[#allocation2 + $0x98] ss:$228 sps:$4 sm:$0xff]  }
 0x106   :  { %2881 = vmatmul.mubr.msk.bf16.vlgmr.msra.gmra.mxu0 %vm392_vm0, %v3425_v3  ;;  %2882 = vmatmul.mubr.msk.bf16.vlgmr.msra.gmra.mxu1 %vm392_vm0, %v3425_v3 }
 0x107   :  { %1564 = vmatpush1.bf16.msra.mxu0 %v3028_v10  ;;  %1605 = vmatpush1.bf16.msra.mxu1 %v3031_v11  ;;  %v3126_v10 = vld [vmem:[#allocation2 + $0x26c] ss:$228 sps:$4 sm:$0xff]   ;;  %v3129_v11 = vld [vmem:[#allocation2 + $0x274] ss:$228 sps:$4 sm:$0xff]  }
 0x108   :  { %1565 = vmatprep.subr.bf16.mxu0 %v3036_v12  ;;  %1606 = vmatprep.subr.bf16.mxu1 %v3039_v13  ;;  %v3124_v12 = vld [vmem:[#allocation2 + $0x268] ss:$228 sps:$4 sm:$0xff]   ;;  %v3127_v13 = vld [vmem:[#allocation2 + $0x270] ss:$228 sps:$4 sm:$0xff]  }
 0x109   :  { %1583 = vmatprep.mubr.bf16.mxu0 %v3263_v49  ;;  %1624 = vmatprep.mubr.bf16.mxu1 %v3263_v49 }
 0x10b   :  { %1566 = vmatpush1.bf16.msra.mxu0 %v3034_v14  ;;  %1607 = vmatpush1.bf16.msra.mxu1 %v3037_v15  ;;  %v3132_v14 = vld [vmem:[#allocation2 + $0xa4] ss:$228 sps:$4 sm:$0xff]   ;;  %v3135_v15 = vld [vmem:[#allocation2 + $0xac] ss:$228 sps:$4 sm:$0xff]  }
 0x10c   :  { %1645 = vmatprep.subr.bf16.mxu0 %v3042_v16  ;;  %1686 = vmatprep.subr.bf16.mxu1 %v3045_v17  ;;  %v3130_v16 = vld [vmem:[#allocation2 + $0xa0] ss:$228 sps:$4 sm:$0xff]   ;;  %v3133_v17 = vld [vmem:[#allocation2 + $0xa8] ss:$228 sps:$4 sm:$0xff]  }
 0x10e   :  { %2883 = vmatmul.mubr.msk.bf16.vlgmr.msra.gmra.mxu0 %vm392_vm0, %v3425_v3  ;;  %2884 = vmatmul.mubr.msk.bf16.vlgmr.msra.gmra.mxu1 %vm392_vm0, %v3425_v3 }
 0x10f   :  { %1646 = vmatpush1.bf16.msra.mxu0 %v3040_v18  ;;  %1687 = vmatpush1.bf16.msra.mxu1 %v3043_v19  ;;  %v3138_v18 = vld [vmem:[#allocation2 + $0x27c] ss:$228 sps:$4 sm:$0xff]   ;;  %v3141_v19 = vld [vmem:[#allocation2 + $0x284] ss:$228 sps:$4 sm:$0xff]  }
 0x110   :  { %1647 = vmatprep.subr.bf16.mxu0 %v3048_v20  ;;  %1688 = vmatprep.subr.bf16.mxu1 %v3051_v21  ;;  %v3136_v20 = vld [vmem:[#allocation2 + $0x278] ss:$228 sps:$4 sm:$0xff]   ;;  %v3139_v21 = vld [vmem:[#allocation2 + $0x280] ss:$228 sps:$4 sm:$0xff]  }
 0x111   :  { %1665 = vmatprep.mubr.bf16.mxu0 %v3263_v49  ;;  %1706 = vmatprep.mubr.bf16.mxu1 %v3263_v49 }
 0x113   :  { %1648 = vmatpush1.bf16.msra.mxu0 %v3046_v22  ;;  %1689 = vmatpush1.bf16.msra.mxu1 %v3049_v23  ;;  %v3144_v22 = vld [vmem:[#allocation2 + $0xb4] ss:$228 sps:$4 sm:$0xff]   ;;  %v3147_v23 = vld [vmem:[#allocation2 + $0xbc] ss:$228 sps:$4 sm:$0xff]  }
 0x114   :  { %1727 = vmatprep.subr.bf16.mxu0 %v3054_v24  ;;  %1768 = vmatprep.subr.bf16.mxu1 %v3057_v25  ;;  %v3142_v24 = vld [vmem:[#allocation2 + $0xb0] ss:$228 sps:$4 sm:$0xff]   ;;  %v3145_v25 = vld [vmem:[#allocation2 + $0xb8] ss:$228 sps:$4 sm:$0xff]  }
 0x116   :  { %2885 = vmatmul.mubr.msk.bf16.vlgmr.msra.gmra.mxu0 %vm392_vm0, %v3425_v3  ;;  %2886 = vmatmul.mubr.msk.bf16.vlgmr.msra.gmra.mxu1 %vm392_vm0, %v3425_v3 }
 0x117   :  { %1728 = vmatpush1.bf16.msra.mxu0 %v3052_v26  ;;  %1769 = vmatpush1.bf16.msra.mxu1 %v3055_v27  ;;  %v3150_v26 = vld [vmem:[#allocation2 + $0x28c] ss:$228 sps:$4 sm:$0xff]   ;;  %v3153_v27 = vld [vmem:[#allocation2 + $0x294] ss:$228 sps:$4 sm:$0xff]  }
 0x118   :  { %1729 = vmatprep.subr.bf16.mxu0 %v3060_v28  ;;  %1770 = vmatprep.subr.bf16.mxu1 %v3063_v29  ;;  %v3148_v28 = vld [vmem:[#allocation2 + $0x288] ss:$228 sps:$4 sm:$0xff]   ;;  %v3151_v29 = vld [vmem:[#allocation2 + $0x290] ss:$228 sps:$4 sm:$0xff]  }
 0x119   :  { %1747 = vmatprep.mubr.bf16.mxu0 %v3263_v49  ;;  %1788 = vmatprep.mubr.bf16.mxu1 %v3263_v49 }
 0x11b   :  { %1730 = vmatpush1.bf16.msra.mxu0 %v3058_v30  ;;  %1771 = vmatpush1.bf16.msra.mxu1 %v3061_v31  ;;  %v3156_v30 = vld [vmem:[#allocation2 + $0xc4] ss:$228 sps:$4 sm:$0xff]   ;;  %v3159_v31 = vld [vmem:[#allocation2 + $0xcc] ss:$228 sps:$4 sm:$0xff]  }
 0x11c   :  { %1809 = vmatprep.subr.bf16.mxu0 %v3066_v32  ;;  %1850 = vmatprep.subr.bf16.mxu1 %v3069_v33  ;;  %v3154_v32 = vld [vmem:[#allocation2 + $0xc0] ss:$228 sps:$4 sm:$0xff]   ;;  %v3157_v33 = vld [vmem:[#allocation2 + $0xc8] ss:$228 sps:$4 sm:$0xff]  }
 0x11e   :  { %2887 = vmatmul.mubr.msk.bf16.vlgmr.msra.gmra.mxu0 %vm392_vm0, %v3425_v3  ;;  %2888 = vmatmul.mubr.msk.bf16.vlgmr.msra.gmra.mxu1 %vm392_vm0, %v3425_v3 }
 0x11f   :  { %1810 = vmatpush1.bf16.msra.mxu0 %v3064_v34  ;;  %1851 = vmatpush1.bf16.msra.mxu1 %v3067_v35  ;;  %v3162_v34 = vld [vmem:[#allocation2 + $0x29c] ss:$228 sps:$4 sm:$0xff]   ;;  %v3165_v35 = vld [vmem:[#allocation2 + $0x2a4] ss:$228 sps:$4 sm:$0xff]  }
 0x120   :  { %1811 = vmatprep.subr.bf16.mxu0 %v3072_v36  ;;  %1852 = vmatprep.subr.bf16.mxu1 %v3075_v37  ;;  %v3160_v36 = vld [vmem:[#allocation2 + $0x298] ss:$228 sps:$4 sm:$0xff]   ;;  %v3163_v37 = vld [vmem:[#allocation2 + $0x2a0] ss:$228 sps:$4 sm:$0xff]  }
 0x121   :  { %1829 = vmatprep.mubr.bf16.mxu0 %v3263_v49  ;;  %1870 = vmatprep.mubr.bf16.mxu1 %v3263_v49 }
 0x123   :  { %1812 = vmatpush1.bf16.msra.mxu0 %v3070_v38  ;;  %1853 = vmatpush1.bf16.msra.mxu1 %v3073_v39  ;;  %v3168_v38 = vld [vmem:[#allocation2 + $0xd4] ss:$228 sps:$4 sm:$0xff]   ;;  %v3171_v39 = vld [vmem:[#allocation2 + $0xdc] ss:$228 sps:$4 sm:$0xff]  }
 0x124   :  { %1891 = vmatprep.subr.bf16.mxu0 %v3078_v40  ;;  %1932 = vmatprep.subr.bf16.mxu1 %v3081_v41  ;;  %v3166_v40 = vld [vmem:[#allocation2 + $0xd0] ss:$228 sps:$4 sm:$0xff]   ;;  %v3169_v41 = vld [vmem:[#allocation2 + $0xd8] ss:$228 sps:$4 sm:$0xff]  }
 0x126   :  { %2889 = vmatmul.mubr.msk.bf16.vlgmr.msra.gmra.mxu0 %vm392_vm0, %v3425_v3  ;;  %2890 = vmatmul.mubr.msk.bf16.vlgmr.msra.gmra.mxu1 %vm392_vm0, %v3425_v3 }
 0x127   :  { %1892 = vmatpush1.bf16.msra.mxu0 %v3076_v42  ;;  %1933 = vmatpush1.bf16.msra.mxu1 %v3079_v43  ;;  %v3172_v42 = vld [vmem:[#allocation2 + $0x2a8] ss:$228 sps:$4 sm:$0xff]   ;;  %v3264_v43 = vmov 0.0  }
 0x128   :  { %1893 = vmatprep.subr.bf16.mxu0 %v3084_v44  ;;  %1934 = vmatprep.subr.bf16.mxu1 %v3087_v45  ;;  %v3173_v44 = vld [vmem:[#allocation2 + $0xe0] ss:$228 sps:$4 sm:$0xff]  }
 0x129   :  { %1911 = vmatprep.mubr.bf16.mxu0 %v3263_v49  ;;  %1952 = vmatprep.mubr.bf16.mxu1 %v3263_v49 }
 0x12b   :  { %1894 = vmatpush1.bf16.msra.mxu0 %v3082_v46  ;;  %1935 = vmatpush1.bf16.msra.mxu1 %v3085_v47 }
 0x12c   :  { %1973 = vmatprep.subr.bf16.mxu0 %v3090_v48  ;;  %2014 = vmatprep.subr.bf16.mxu1 %v3093_v50  ;;  %v511_v48 = vld [vmem:[%s3621_s4] sm:$0xff] }
 0x12e   :  { %2891 = vmatmul.mubr.msk.bf16.vlgmr.msra.gmra.mxu0 %vm392_vm0, %v3425_v3  ;;  %2892 = vmatmul.mubr.msk.bf16.vlgmr.msra.gmra.mxu1 %vm392_vm0, %v3425_v3 }
 0x12f   :  { %1974 = vmatpush1.bf16.msra.mxu0 %v3088_v51  ;;  %2015 = vmatpush1.bf16.msra.mxu1 %v3091_v52 }
 0x130   :  { %1975 = vmatprep.subr.bf16.mxu0 %v3096_v53  ;;  %2016 = vmatprep.subr.bf16.mxu1 %v3099_v54 }
 0x131   :  { %1993 = vmatprep.mubr.bf16.mxu0 %v3263_v49  ;;  %2034 = vmatprep.mubr.bf16.mxu1 %v3263_v49 }
 0x133   :  { %1976 = vmatpush1.bf16.msra.mxu0 %v3094_v55  ;;  %2017 = vmatpush1.bf16.msra.mxu1 %v3097_v56 }
 0x134   :  { %2055 = vmatprep.subr.bf16.mxu0 %v3102_v57  ;;  %2096 = vmatprep.subr.bf16.mxu1 %v3105_v58 }
 0x136   :  { %2893 = vmatmul.mubr.msk.bf16.vlgmr.msra.gmra.mxu0 %vm392_vm0, %v3425_v3  ;;  %2894 = vmatmul.mubr.msk.bf16.vlgmr.msra.gmra.mxu1 %vm392_vm0, %v3425_v3 }
 0x137   :  { %2056 = vmatpush1.bf16.msra.mxu0 %v3100_v59  ;;  %2097 = vmatpush1.bf16.msra.mxu1 %v3103_v60 }
 0x138   :  { %2057 = vmatprep.subr.bf16.mxu0 %v3108_v61  ;;  %2098 = vmatprep.subr.bf16.mxu1 %v3111_v62 }
 0x139   :  { %2075 = vmatprep.mubr.bf16.mxu0 %v3263_v49  ;;  %2116 = vmatprep.mubr.bf16.mxu1 %v3263_v49 }
 0x13b   :  { %2058 = vmatpush1.bf16.msra.mxu0 %v3106_v63  ;;  %2099 = vmatpush1.bf16.msra.mxu1 %v3109_v0 }
 0x13c   :  { %2137 = vmatprep.subr.bf16.mxu0 %v3114_v1  ;;  %2178 = vmatprep.subr.bf16.mxu1 %v3117_v2 }
 0x13e   :  { %2895 = vmatmul.mubr.msk.bf16.vlgmr.msra.gmra.mxu0 %vm392_vm0, %v3425_v3  ;;  %2896 = vmatmul.mubr.msk.bf16.vlgmr.msra.gmra.mxu1 %vm392_vm0, %v3425_v3 }
 0x13f   :  { %2138 = vmatpush1.bf16.msra.mxu0 %v3112_v4  ;;  %2179 = vmatpush1.bf16.msra.mxu1 %v3115_v5 }
 0x140   :  { %2139 = vmatprep.subr.bf16.mxu0 %v3120_v6  ;;  %2180 = vmatprep.subr.bf16.mxu1 %v3123_v7 }
 0x141   :  { %2157 = vmatprep.mubr.bf16.mxu0 %v3263_v49  ;;  %2198 = vmatprep.mubr.bf16.mxu1 %v3263_v49 }
 0x143   :  { %2140 = vmatpush1.bf16.msra.mxu0 %v3118_v8  ;;  %2181 = vmatpush1.bf16.msra.mxu1 %v3121_v9 }
 0x144   :  { %2219 = vmatprep.subr.bf16.mxu0 %v3126_v10  ;;  %2260 = vmatprep.subr.bf16.mxu1 %v3129_v11 }
 0x146   :  { %2897 = vmatmul.mubr.msk.bf16.vlgmr.msra.gmra.mxu0 %vm392_vm0, %v3425_v3  ;;  %2898 = vmatmul.mubr.msk.bf16.vlgmr.msra.gmra.mxu1 %vm392_vm0, %v3425_v3 }
 0x147   :  { %2220 = vmatpush1.bf16.msra.mxu0 %v3124_v12  ;;  %2261 = vmatpush1.bf16.msra.mxu1 %v3127_v13 }
 0x148   :  { %2221 = vmatprep.subr.bf16.mxu0 %v3132_v14  ;;  %2262 = vmatprep.subr.bf16.mxu1 %v3135_v15 }
 0x149   :  { %2239 = vmatprep.mubr.bf16.mxu0 %v3263_v49  ;;  %2280 = vmatprep.mubr.bf16.mxu1 %v3263_v49 }
 0x14b   :  { %2222 = vmatpush1.bf16.msra.mxu0 %v3130_v16  ;;  %2263 = vmatpush1.bf16.msra.mxu1 %v3133_v17 }
 0x14c   :  { %2301 = vmatprep.subr.bf16.mxu0 %v3138_v18  ;;  %2342 = vmatprep.subr.bf16.mxu1 %v3141_v19 }
 0x14e   :  { %2899 = vmatmul.mubr.msk.bf16.vlgmr.msra.gmra.mxu0 %vm392_vm0, %v3425_v3  ;;  %2900 = vmatmul.mubr.msk.bf16.vlgmr.msra.gmra.mxu1 %vm392_vm0, %v3425_v3 }
 0x14f   :  { %2302 = vmatpush1.bf16.msra.mxu0 %v3136_v20  ;;  %2343 = vmatpush1.bf16.msra.mxu1 %v3139_v21 }
 0x150   :  { %2303 = vmatprep.subr.bf16.mxu0 %v3144_v22  ;;  %2344 = vmatprep.subr.bf16.mxu1 %v3147_v23 }
 0x151   :  { %2321 = vmatprep.mubr.bf16.mxu0 %v3263_v49  ;;  %2362 = vmatprep.mubr.bf16.mxu1 %v3263_v49 }
 0x153   :  { %2304 = vmatpush1.bf16.msra.mxu0 %v3142_v24  ;;  %2345 = vmatpush1.bf16.msra.mxu1 %v3145_v25 }
 0x154   :  { %2383 = vmatprep.subr.bf16.mxu0 %v3150_v26  ;;  %2424 = vmatprep.subr.bf16.mxu1 %v3153_v27 }
 0x156   :  { %2901 = vmatmul.mubr.msk.bf16.vlgmr.msra.gmra.mxu0 %vm392_vm0, %v3425_v3  ;;  %2902 = vmatmul.mubr.msk.bf16.vlgmr.msra.gmra.mxu1 %vm392_vm0, %v3425_v3 }
 0x157   :  { %2384 = vmatpush1.bf16.msra.mxu0 %v3148_v28  ;;  %2425 = vmatpush1.bf16.msra.mxu1 %v3151_v29 }
 0x158   :  { %2385 = vmatprep.subr.bf16.mxu0 %v3156_v30  ;;  %2426 = vmatprep.subr.bf16.mxu1 %v3159_v31 }
 0x159   :  { %2403 = vmatprep.mubr.bf16.mxu0 %v3263_v49  ;;  %2444 = vmatprep.mubr.bf16.mxu1 %v3263_v49 }
 0x15b   :  { %2386 = vmatpush1.bf16.msra.mxu0 %v3154_v32  ;;  %2427 = vmatpush1.bf16.msra.mxu1 %v3157_v33 }
 0x15c   :  { %2465 = vmatprep.subr.bf16.mxu0 %v3162_v34  ;;  %2506 = vmatprep.subr.bf16.mxu1 %v3165_v35 }
 0x15e   :  { %2903 = vmatmul.mubr.msk.bf16.vlgmr.msra.gmra.mxu0 %vm392_vm0, %v3425_v3  ;;  %2904 = vmatmul.mubr.msk.bf16.vlgmr.msra.gmra.mxu1 %vm392_vm0, %v3425_v3 }
 0x15f   :  { %2466 = vmatpush1.bf16.msra.mxu0 %v3160_v36  ;;  %2507 = vmatpush1.bf16.msra.mxu1 %v3163_v37 }
 0x160   :  { %2467 = vmatprep.subr.bf16.mxu0 %v3168_v38  ;;  %2508 = vmatprep.subr.bf16.mxu1 %v3171_v39 }
 0x161   :  { %2485 = vmatprep.mubr.bf16.mxu0 %v3263_v49  ;;  %2526 = vmatprep.mubr.bf16.mxu1 %v3263_v49  ;;  %v527_v49 = vlaneseq }
 0x163   :  { %2468 = vmatpush1.bf16.msra.mxu0 %v3166_v40  ;;  %2509 = vmatpush1.bf16.msra.mxu1 %v3169_v41  ;;  %v528_v45 = vshrl.u32 %v527_v49, 7 }
 0x164   :  { %2955 = vmatprep.subr.bf16.mxu0 %v3264_v43 }
 0x165   :  { %v3512_v46 = vsub.s32 0, %v528_v45  ;;  %v3514_v47 = vsub.s32 2, %v528_v45  ;;  %v3519_v50 = vsub.s32 1, %v528_v45  ;;  %v3521_v51 = vsub.s32 3, %v528_v45 }
 0x166   :  { %2905 = vmatmul.mubr.msk.bf16.vlgmr.msra.gmra.mxu0 %vm392_vm0, %v3425_v3  ;;  %2906 = vmatmul.mubr.msk.bf16.vlgmr.msra.gmra.mxu1 %vm392_vm0, %v3425_v3  ;;  %v3527_v59 = vsub.s32 4, %v528_v45  ;;  %v3529_v60 = vsub.s32 6, %v528_v45  ;;  %v3531_v63 = vsub.s32 5, %v528_v45  ;;  %v3533_v0 = vsub.s32 7, %v528_v45 }
 0x167   :  { %2956 = vmatpush3.bf16.msra.mxu0 %v3172_v42  ;;  %2959 = vmatprep.mubr.msk.bf16.mxu0 %vm3265_vm1, %v3264_v43  ;;  %v530_v52 = vrot.slane %v511_v48, %v3512_v46  ;;  %v538_v53 = vrot.slane %v511_v48, %v3514_v47  ;;  %v542_v54 = vrot.slane %v511_v48, %v3521_v51 }
 0x168   :  { %2957 = vmatprep.subr.bf16.mxu0 %v3264_v43  ;;  %v546_v10 = vrot.slane %v511_v48, %v3527_v59  ;;  %v554_v11 = vrot.slane %v511_v48, %v3529_v60  ;;  %v550_v14 = vrot.slane %v511_v48, %v3531_v63  ;;  %v558_v15 = vrot.slane %v511_v48, %v3533_v0 }
 0x16b   :  { %2958 = vmatpush3.bf16.msra.mxu0 %v3173_v44 }
 0x16e   :  { %2960 = vmatmul.mubr.msk.bf16.vlgmr.msra.gmra.mxu0 %vm392_vm0, %v3425_v3  ;;  %v534_v3 = vrot.slane %v511_v48, %v3519_v50 }
 0x1be   :  { %v1421_v55 = vpop.f32.mrf.mxu0  ;;  %v1462_v56 = vpop.f32.mrf.mxu1 }
 0x1bf   :  { %v1422_v57 = vadd.f32 %v1421_v55, %v530_v52  ;;  %v1463_v58 = vadd.f32 %v1462_v56, %v538_v53 }
 0x1c0   :  { %v1423_v61 = vpop.f32.mrf.mxu0  ;;  %v1464_v62 = vpop.f32.mrf.mxu1 }
 0x1c1   :  { %v2575_v1 = vmax.f32 %v1422_v57, 0.0  ;;  %v2577_v2 = vmax.f32 %v1463_v58, 0.0  ;;  %v1424_v4 = vadd.f32 %v1423_v61, %v534_v3  ;;  %v1465_v5 = vadd.f32 %v1464_v62, %v542_v54 }
 0x1c2   :  { %v1425_v6 = vpop.f32.mrf.mxu0  ;;  %v1466_v7 = vpop.f32.mrf.mxu1 }
 0x1c3   :  { %2632 = vst [vmem:[#allocation5] sm:$0xff] %v2575_v1  ;;  %2634 = vst [vmem:[#allocation5 + $0x10] sm:$0xff] %v2577_v2  ;;  %v2576_v8 = vmax.f32 %v1424_v4, 0.0  ;;  %v2578_v9 = vmax.f32 %v1465_v5, 0.0 }
 0x1c4   :  { %v1426_v12 = vpop.f32.mrf.mxu0  ;;  %v1467_v13 = vpop.f32.mrf.mxu1 }
 0x1c5   :  { %2633 = vst [vmem:[#allocation5 + $0x8] sm:$0xff] %v2576_v8  ;;  %2635 = vst [vmem:[#allocation5 + $0x18] sm:$0xff] %v2578_v9 }
 0x1c6   :  { %v1503_v16 = vpop.f32.mrf.mxu0  ;;  %v1544_v17 = vpop.f32.mrf.mxu1 }
 0x1c7   :  { %3205 = shalt.err (!%p3202_p9)
}
 0x1c8   :  { %2698 = dma.vmem_to_hbm [thread:$0]  %s2696_s10, 512, %s3622_s5, [#allocation4]   ;;  %v1504_v18 = vadd.f32 %v1503_v16, %v546_v10  ;;  %v1545_v19 = vadd.f32 %v1544_v17, %v554_v11  ;;  %v1505_v20 = vpop.f32.mrf.mxu0  ;;  %v1546_v21 = vpop.f32.mrf.mxu1  ;;  %v512_v22 = vld [vmem:[%s3621_s4 + $0x8] sm:$0xff]  ;;  %v513_v7 = vld [vmem:[%s3621_s4 + $0x10] sm:$0xff] }
 0x1c9   :  { %v1506_v25 = vadd.f32 %v1505_v20, %v550_v14  ;;  %v1547_v26 = vadd.f32 %v1546_v21, %v558_v15  ;;  %v562_v31 = vrot.slane %v512_v22, %v3512_v46  ;;  %v570_v32 = vrot.slane %v512_v22, %v3514_v47  ;;  %s3267_s26 = smov [#allocation6]   ;;  %s3268_s28 = smov [#allocation8]  }
 0x1ca   :  { %v2579_v23 = vmax.f32 %v1504_v18, 0.0  ;;  %v2581_v24 = vmax.f32 %v1545_v19, 0.0  ;;  %v1507_v27 = vpop.f32.mrf.mxu0  ;;  %v1548_v28 = vpop.f32.mrf.mxu1  ;;  %v566_v35 = vrot.slane %v512_v22, %v3519_v50  ;;  %v574_v36 = vrot.slane %v512_v22, %v3521_v51  ;;  %s2705_s27 = sshll.u32 %s3267_s26, 4  ;;  %s2715_s29 = sshll.u32 %s3268_s28, 4  ;;  %s2706_s27 = int_to_ptr.vmem [resolvable:$true] %s2705_s27  ;;  %s2716_s29 = int_to_ptr.vmem [resolvable:$true] %s2715_s29 }
 0x1cb   :  { %v2580_v29 = vmax.f32 %v1506_v25, 0.0  ;;  %v2582_v30 = vmax.f32 %v1547_v26, 0.0  ;;  %v578_v54 = vrot.slane %v512_v22, %v3527_v59  ;;  %v586_v55 = vrot.slane %v512_v22, %v3529_v60  ;;  %s3214_s30 = scalar_lea.vmem %s2706_s27, 6784  ;;  %p3219_p11 = scmp.lt.s32.totalorder %s2706_s27, %s2706_s27 }
 0x1cc   :  { %2636 = vst [vmem:[#allocation6] sm:$0xff] %v2579_v23  ;;  %2638 = vst [vmem:[#allocation6 + $0x10] sm:$0xff] %v2581_v24  ;;  %v1508_v33 = vpop.f32.mrf.mxu0  ;;  %v1549_v34 = vpop.f32.mrf.mxu1  ;;  %v582_v58 = vrot.slane %v512_v22, %v3531_v63  ;;  %v590_v61 = vrot.slane %v512_v22, %v3533_v0  ;;  %v594_v16 = vrot.slane %v513_v7, %v3512_v46  ;;  %p3215_p10 = scmp.ne.s32.totalorder %s2706_s27, %s3214_s30  ;;  %p3220_p12 = scmp.lt.s32.totalorder %s3214_s30, %s3214_s30 }
 0x1cd   :  { %2637 = vst [vmem:[#allocation6 + $0x8] sm:$0xff] %v2580_v29  ;;  %2639 = vst [vmem:[#allocation6 + $0x18] sm:$0xff] %v2582_v30  ;;  %v602_v17 = vrot.slane %v513_v7, %v3514_v47  ;;  %v598_v20 = vrot.slane %v513_v7, %v3519_v50  ;;  %v606_v21 = vrot.slane %v513_v7, %v3521_v51 }
 0x1ce   :  { %v1585_v37 = vpop.f32.mrf.mxu0  ;;  %v1626_v38 = vpop.f32.mrf.mxu1  ;;  %p3221_p13 = por %p3220_p12, %p3219_p11 }
 0x1cf   :  { %v1586_v39 = vadd.f32 %v1585_v37, %v562_v31  ;;  %v1627_v40 = vadd.f32 %v1626_v38, %v570_v32  ;;  %v618_v37 = vrot.slane %v513_v7, %v3529_v60 }
 0x1d0   :  { %v1587_v41 = vpop.f32.mrf.mxu0  ;;  %v1628_v42 = vpop.f32.mrf.mxu1  ;;  %p3222_p0 = pnand %p3221_p13, %p3215_p10 }
 0x1d1   :  { %v2583_v43 = vmax.f32 %v1586_v39, 0.0  ;;  %v2585_v44 = vmax.f32 %v1627_v40, 0.0  ;;  %v1588_v49 = vadd.f32 %v1587_v41, %v566_v35  ;;  %v1629_v45 = vadd.f32 %v1628_v42, %v574_v36 }
 0x1d2   :  { %v1589_v48 = vpop.f32.mrf.mxu0  ;;  %v1630_v52 = vpop.f32.mrf.mxu1  ;;  %v610_v36 = vrot.slane %v513_v7, %v3527_v59  ;;  %v614_v40 = vrot.slane %v513_v7, %v3531_v63  ;;  %v622_v41 = vrot.slane %v513_v7, %v3533_v0 }
 0x1d3   :  { %2640 = vst [vmem:[#allocation6 + $0x20] sm:$0xff] %v2583_v43  ;;  %2642 = vst [vmem:[#allocation6 + $0x30] sm:$0xff] %v2585_v44  ;;  %v2584_v53 = vmax.f32 %v1588_v49, 0.0  ;;  %v2586_v3 = vmax.f32 %v1629_v45, 0.0  ;;  %v514_v52 = vld [vmem:[%s3621_s4 + $0x18] sm:$0xff] }
 0x1d4   :  { %v1590_v56 = vpop.f32.mrf.mxu0  ;;  %v1631_v57 = vpop.f32.mrf.mxu1 }
 0x1d5   :  { %2641 = vst [vmem:[#allocation6 + $0x28] sm:$0xff] %v2584_v53  ;;  %2643 = vst [vmem:[#allocation6 + $0x38] sm:$0xff] %v2586_v3 }
 0x1d6   :  { %v1667_v62 = vpop.f32.mrf.mxu0  ;;  %v1708_v1 = vpop.f32.mrf.mxu1 }
 0x1d7   :  { %v1668_v2 = vadd.f32 %v1667_v62, %v578_v54  ;;  %v1709_v4 = vadd.f32 %v1708_v1, %v586_v55  ;;  %v626_v62 = vrot.slane %v514_v52, %v3512_v46  ;;  %v634_v1 = vrot.slane %v514_v52, %v3514_v47 }
 0x1d8   :  { %v1669_v5 = vpop.f32.mrf.mxu0  ;;  %v1710_v6 = vpop.f32.mrf.mxu1 }
 0x1d9   :  { %v2587_v8 = vmax.f32 %v1668_v2, 0.0  ;;  %v2589_v9 = vmax.f32 %v1709_v4, 0.0  ;;  %v1670_v10 = vadd.f32 %v1669_v5, %v582_v58  ;;  %v1711_v11 = vadd.f32 %v1710_v6, %v590_v61 }
 0x1da   :  { %v1671_v12 = vpop.f32.mrf.mxu0  ;;  %v1712_v13 = vpop.f32.mrf.mxu1  ;;  %v630_v5 = vrot.slane %v514_v52, %v3519_v50  ;;  %v638_v6 = vrot.slane %v514_v52, %v3521_v51 }
 0x1db   :  { %2644 = vst [vmem:[#allocation6 + $0x40] sm:$0xff] %v2587_v8  ;;  %2646 = vst [vmem:[#allocation6 + $0x50] sm:$0xff] %v2589_v9  ;;  %v2588_v14 = vmax.f32 %v1670_v10, 0.0  ;;  %v2590_v15 = vmax.f32 %v1711_v11, 0.0 }
 0x1dc   :  { %v1672_v18 = vpop.f32.mrf.mxu0  ;;  %v1713_v19 = vpop.f32.mrf.mxu1 }
 0x1dd   :  { %2645 = vst [vmem:[#allocation6 + $0x48] sm:$0xff] %v2588_v14  ;;  %2647 = vst [vmem:[#allocation6 + $0x58] sm:$0xff] %v2590_v15 }
 0x1de   :  { %v1749_v22 = vpop.f32.mrf.mxu0  ;;  %v1790_v23 = vpop.f32.mrf.mxu1 }
 0x1df   :  { %v1750_v24 = vadd.f32 %v1749_v22, %v594_v16  ;;  %v1791_v25 = vadd.f32 %v1790_v23, %v602_v17  ;;  %v650_v22 = vrot.slane %v514_v52, %v3529_v60 }
 0x1e0   :  { %v1751_v26 = vpop.f32.mrf.mxu0  ;;  %v1792_v27 = vpop.f32.mrf.mxu1 }
 0x1e1   :  { %v2591_v28 = vmax.f32 %v1750_v24, 0.0  ;;  %v2593_v29 = vmax.f32 %v1791_v25, 0.0  ;;  %v1752_v30 = vadd.f32 %v1751_v26, %v598_v20  ;;  %v1793_v31 = vadd.f32 %v1792_v27, %v606_v21 }
 0x1e2   :  { %v1753_v32 = vpop.f32.mrf.mxu0  ;;  %v1794_v33 = vpop.f32.mrf.mxu1  ;;  %v642_v21 = vrot.slane %v514_v52, %v3527_v59  ;;  %v646_v25 = vrot.slane %v514_v52, %v3531_v63  ;;  %v654_v26 = vrot.slane %v514_v52, %v3533_v0 }
 0x1e3   :  { %2648 = vst [vmem:[#allocation6 + $0x60] sm:$0xff] %v2591_v28  ;;  %2650 = vst [vmem:[#allocation6 + $0x70] sm:$0xff] %v2593_v29  ;;  %v2592_v34 = vmax.f32 %v1752_v30, 0.0  ;;  %v2594_v35 = vmax.f32 %v1793_v31, 0.0  ;;  %v515_v33 = vld [vmem:[%s3621_s4 + $0x20] sm:$0xff] }
 0x1e4   :  { %v1754_v38 = vpop.f32.mrf.mxu0  ;;  %v1795_v39 = vpop.f32.mrf.mxu1 }
 0x1e5   :  { %2649 = vst [vmem:[#allocation6 + $0x68] sm:$0xff] %v2592_v34  ;;  %2651 = vst [vmem:[#allocation6 + $0x78] sm:$0xff] %v2594_v35 }
 0x1e6   :  { %v1831_v42 = vpop.f32.mrf.mxu0  ;;  %v1872_v43 = vpop.f32.mrf.mxu1 }
 0x1e7   :  { %v1832_v44 = vadd.f32 %v1831_v42, %v610_v36  ;;  %v1873_v49 = vadd.f32 %v1872_v43, %v618_v37  ;;  %v658_v42 = vrot.slane %v515_v33, %v3512_v46  ;;  %v666_v43 = vrot.slane %v515_v33, %v3514_v47 }
 0x1e8   :  { %v1833_v45 = vpop.f32.mrf.mxu0  ;;  %v1874_v48 = vpop.f32.mrf.mxu1 }
 0x1e9   :  { %v2595_v53 = vmax.f32 %v1832_v44, 0.0  ;;  %v2597_v3 = vmax.f32 %v1873_v49, 0.0  ;;  %v1834_v54 = vadd.f32 %v1833_v45, %v614_v40  ;;  %v1875_v55 = vadd.f32 %v1874_v48, %v622_v41 }
 0x1ea   :  { %v1835_v56 = vpop.f32.mrf.mxu0  ;;  %v1876_v57 = vpop.f32.mrf.mxu1  ;;  %v662_v45 = vrot.slane %v515_v33, %v3519_v50  ;;  %v670_v48 = vrot.slane %v515_v33, %v3521_v51 }
 0x1eb   :  { %2652 = vst [vmem:[#allocation6 + $0x80] sm:$0xff] %v2595_v53  ;;  %2654 = vst [vmem:[#allocation6 + $0x90] sm:$0xff] %v2597_v3  ;;  %v2596_v58 = vmax.f32 %v1834_v54, 0.0  ;;  %v2598_v61 = vmax.f32 %v1875_v55, 0.0 }
 0x1ec   :  { %v1836_v2 = vpop.f32.mrf.mxu0  ;;  %v1877_v4 = vpop.f32.mrf.mxu1 }
 0x1ed   :  { %2653 = vst [vmem:[#allocation6 + $0x88] sm:$0xff] %v2596_v58  ;;  %2655 = vst [vmem:[#allocation6 + $0x98] sm:$0xff] %v2598_v61 }
 0x1ee   :  { %v1913_v7 = vpop.f32.mrf.mxu0  ;;  %v1954_v8 = vpop.f32.mrf.mxu1 }
 0x1ef   :  { %v1914_v9 = vadd.f32 %v1913_v7, %v626_v62  ;;  %v1955_v10 = vadd.f32 %v1954_v8, %v634_v1  ;;  %v682_v7 = vrot.slane %v515_v33, %v3529_v60 }
 0x1f0   :  { %v1915_v11 = vpop.f32.mrf.mxu0  ;;  %v1956_v12 = vpop.f32.mrf.mxu1 }
 0x1f1   :  { %v2599_v13 = vmax.f32 %v1914_v9, 0.0  ;;  %v2601_v14 = vmax.f32 %v1955_v10, 0.0  ;;  %v1916_v15 = vadd.f32 %v1915_v11, %v630_v5  ;;  %v1957_v16 = vadd.f32 %v1956_v12, %v638_v6 }
 0x1f2   :  { %v1917_v17 = vpop.f32.mrf.mxu0  ;;  %v1958_v18 = vpop.f32.mrf.mxu1  ;;  %v674_v6 = vrot.slane %v515_v33, %v3527_v59  ;;  %v678_v10 = vrot.slane %v515_v33, %v3531_v63  ;;  %v686_v11 = vrot.slane %v515_v33, %v3533_v0 }
 0x1f3   :  { %2656 = vst [vmem:[#allocation6 + $0xa0] sm:$0xff] %v2599_v13  ;;  %2658 = vst [vmem:[#allocation6 + $0xb0] sm:$0xff] %v2601_v14  ;;  %v2600_v19 = vmax.f32 %v1916_v15, 0.0  ;;  %v2602_v20 = vmax.f32 %v1957_v16, 0.0  ;;  %v516_v18 = vld [vmem:[%s3621_s4 + $0x28] sm:$0xff] }
 0x1f4   :  { %v1918_v23 = vpop.f32.mrf.mxu0  ;;  %v1959_v24 = vpop.f32.mrf.mxu1 }
 0x1f5   :  { %2657 = vst [vmem:[#allocation6 + $0xa8] sm:$0xff] %v2600_v19  ;;  %2659 = vst [vmem:[#allocation6 + $0xb8] sm:$0xff] %v2602_v20 }
 0x1f6   :  { %v1995_v27 = vpop.f32.mrf.mxu0  ;;  %v2036_v28 = vpop.f32.mrf.mxu1 }
 0x1f7   :  { %v1996_v29 = vadd.f32 %v1995_v27, %v642_v21  ;;  %v2037_v30 = vadd.f32 %v2036_v28, %v650_v22  ;;  %v690_v27 = vrot.slane %v516_v18, %v3512_v46  ;;  %v698_v28 = vrot.slane %v516_v18, %v3514_v47 }
 0x1f8   :  { %v1997_v31 = vpop.f32.mrf.mxu0  ;;  %v2038_v32 = vpop.f32.mrf.mxu1 }
 0x1f9   :  { %v2603_v34 = vmax.f32 %v1996_v29, 0.0  ;;  %v2605_v35 = vmax.f32 %v2037_v30, 0.0  ;;  %v1998_v36 = vadd.f32 %v1997_v31, %v646_v25  ;;  %v2039_v37 = vadd.f32 %v2038_v32, %v654_v26 }
 0x1fa   :  { %v1999_v38 = vpop.f32.mrf.mxu0  ;;  %v2040_v39 = vpop.f32.mrf.mxu1  ;;  %v694_v31 = vrot.slane %v516_v18, %v3519_v50  ;;  %v702_v32 = vrot.slane %v516_v18, %v3521_v51 }
 0x1fb   :  { %2660 = vst [vmem:[#allocation6 + $0xc0] sm:$0xff] %v2603_v34  ;;  %2662 = vst [vmem:[#allocation6 + $0xd0] sm:$0xff] %v2605_v35  ;;  %v2604_v40 = vmax.f32 %v1998_v36, 0.0  ;;  %v2606_v41 = vmax.f32 %v2039_v37, 0.0 }
 0x1fc   :  { %v2000_v44 = vpop.f32.mrf.mxu0  ;;  %v2041_v49 = vpop.f32.mrf.mxu1 }
 0x1fd   :  { %2661 = vst [vmem:[#allocation6 + $0xc8] sm:$0xff] %v2604_v40  ;;  %2663 = vst [vmem:[#allocation6 + $0xd8] sm:$0xff] %v2606_v41 }
 0x1fe   :  { %v2077_v52 = vpop.f32.mrf.mxu0  ;;  %v2118_v53 = vpop.f32.mrf.mxu1 }
 0x1ff   :  { %v2078_v3 = vadd.f32 %v2077_v52, %v658_v42  ;;  %v2119_v54 = vadd.f32 %v2118_v53, %v666_v43  ;;  %v714_v52 = vrot.slane %v516_v18, %v3529_v60 }
 0x200   :  { %v2079_v55 = vpop.f32.mrf.mxu0  ;;  %v2120_v56 = vpop.f32.mrf.mxu1 }
 0x201   :  { %v2607_v57 = vmax.f32 %v2078_v3, 0.0  ;;  %v2609_v58 = vmax.f32 %v2119_v54, 0.0  ;;  %v2080_v61 = vadd.f32 %v2079_v55, %v662_v45  ;;  %v2121_v62 = vadd.f32 %v2120_v56, %v670_v48 }
 0x202   :  { %v2081_v1 = vpop.f32.mrf.mxu0  ;;  %v2122_v2 = vpop.f32.mrf.mxu1  ;;  %v706_v48 = vrot.slane %v516_v18, %v3527_v59  ;;  %v710_v54 = vrot.slane %v516_v18, %v3531_v63  ;;  %v718_v55 = vrot.slane %v516_v18, %v3533_v0 }
 0x203   :  { %2664 = vst [vmem:[#allocation6 + $0xe0] sm:$0xff] %v2607_v57  ;;  %2666 = vst [vmem:[#allocation6 + $0xf0] sm:$0xff] %v2609_v58  ;;  %v2608_v4 = vmax.f32 %v2080_v61, 0.0  ;;  %v2610_v5 = vmax.f32 %v2121_v62, 0.0  ;;  %v517_v2 = vld [vmem:[%s3621_s4 + $0x30] sm:$0xff] }
 0x204   :  { %v2082_v8 = vpop.f32.mrf.mxu0  ;;  %v2123_v9 = vpop.f32.mrf.mxu1 }
 0x205   :  { %2665 = vst [vmem:[#allocation6 + $0xe8] sm:$0xff] %v2608_v4  ;;  %2667 = vst [vmem:[#allocation6 + $0xf8] sm:$0xff] %v2610_v5 }
 0x206   :  { %v2159_v12 = vpop.f32.mrf.mxu0  ;;  %v2200_v13 = vpop.f32.mrf.mxu1 }
 0x207   :  { %v2160_v14 = vadd.f32 %v2159_v12, %v674_v6  ;;  %v2201_v15 = vadd.f32 %v2200_v13, %v682_v7  ;;  %v722_v12 = vrot.slane %v517_v2, %v3512_v46  ;;  %v730_v13 = vrot.slane %v517_v2, %v3514_v47 }
 0x208   :  { %v2161_v16 = vpop.f32.mrf.mxu0  ;;  %v2202_v17 = vpop.f32.mrf.mxu1 }
 0x209   :  { %v2611_v19 = vmax.f32 %v2160_v14, 0.0  ;;  %v2613_v20 = vmax.f32 %v2201_v15, 0.0  ;;  %v2162_v21 = vadd.f32 %v2161_v16, %v678_v10  ;;  %v2203_v22 = vadd.f32 %v2202_v17, %v686_v11 }
 0x20a   :  { %v2163_v23 = vpop.f32.mrf.mxu0  ;;  %v2204_v24 = vpop.f32.mrf.mxu1  ;;  %v726_v16 = vrot.slane %v517_v2, %v3519_v50  ;;  %v734_v17 = vrot.slane %v517_v2, %v3521_v51  ;;  %v738_v50 = vrot.slane %v517_v2, %v3527_v59  ;;  %v746_v51 = vrot.slane %v517_v2, %v3529_v60 }
 0x20b   :  { %2668 = vst [vmem:[#allocation6 + $0x100] sm:$0xff] %v2611_v19  ;;  %2670 = vst [vmem:[#allocation6 + $0x110] sm:$0xff] %v2613_v20  ;;  %v2612_v25 = vmax.f32 %v2162_v21, 0.0  ;;  %v2614_v26 = vmax.f32 %v2203_v22, 0.0 }
 0x20c   :  { %v2164_v29 = vpop.f32.mrf.mxu0  ;;  %v2205_v30 = vpop.f32.mrf.mxu1 }
 0x20d   :  { %2669 = vst [vmem:[#allocation6 + $0x108] sm:$0xff] %v2612_v25  ;;  %2671 = vst [vmem:[#allocation6 + $0x118] sm:$0xff] %v2614_v26 }
 0x20e   :  { %v2241_v33 = vpop.f32.mrf.mxu0  ;;  %v2282_v34 = vpop.f32.mrf.mxu1 }
 0x20f   :  { %v2242_v35 = vadd.f32 %v2241_v33, %v690_v27  ;;  %v2283_v36 = vadd.f32 %v2282_v34, %v698_v28  ;;  %v750_v33 = vrot.slane %v517_v2, %v3533_v0  ;;  %v2764_v0 = vld [vmem:[%s3621_s4 + $0x38] ss:$0 sm:$0xff] }
 0x210   :  { %v2243_v37 = vpop.f32.mrf.mxu0  ;;  %v2284_v38 = vpop.f32.mrf.mxu1 }
 0x211   :  { %v2615_v39 = vmax.f32 %v2242_v35, 0.0  ;;  %v2617_v40 = vmax.f32 %v2283_v36, 0.0  ;;  %v2244_v41 = vadd.f32 %v2243_v37, %v694_v31  ;;  %v2285_v42 = vadd.f32 %v2284_v38, %v702_v32 }
 0x212   :  { %v2245_v43 = vpop.f32.mrf.mxu0  ;;  %v2286_v44 = vpop.f32.mrf.mxu1  ;;  %v742_v32 = vrot.slane %v517_v2, %v3531_v63 }
 0x213   :  { %2672 = vst [vmem:[#allocation6 + $0x120] sm:$0xff] %v2615_v39  ;;  %2674 = vst [vmem:[#allocation6 + $0x130] sm:$0xff] %v2617_v40  ;;  %v2616_v49 = vmax.f32 %v2244_v41, 0.0  ;;  %v2618_v45 = vmax.f32 %v2285_v42, 0.0 }
 0x214   :  { %v2246_v53 = vpop.f32.mrf.mxu0  ;;  %v2287_v3 = vpop.f32.mrf.mxu1 }
 0x215   :  { %2673 = vst [vmem:[#allocation6 + $0x128] sm:$0xff] %v2616_v49  ;;  %2675 = vst [vmem:[#allocation6 + $0x138] sm:$0xff] %v2618_v45 }
 0x216   :  { %v2323_v56 = vpop.f32.mrf.mxu0  ;;  %v2364_v57 = vpop.f32.mrf.mxu1 }
 0x217   :  { %v2324_v58 = vadd.f32 %v2323_v56, %v706_v48  ;;  %v2365_v61 = vadd.f32 %v2364_v57, %v714_v52 }
 0x218   :  { %v2325_v62 = vpop.f32.mrf.mxu0  ;;  %v2366_v1 = vpop.f32.mrf.mxu1 }
 0x219   :  { %v2619_v4 = vmax.f32 %v2324_v58, 0.0  ;;  %v2621_v5 = vmax.f32 %v2365_v61, 0.0  ;;  %v2326_v6 = vadd.f32 %v2325_v62, %v710_v54  ;;  %v2367_v7 = vadd.f32 %v2366_v1, %v718_v55 }
 0x21a   :  { %v2327_v8 = vpop.f32.mrf.mxu0  ;;  %v2368_v9 = vpop.f32.mrf.mxu1 }
 0x21b   :  { %2676 = vst [vmem:[#allocation6 + $0x140] sm:$0xff] %v2619_v4  ;;  %2678 = vst [vmem:[#allocation6 + $0x150] sm:$0xff] %v2621_v5  ;;  %v2620_v10 = vmax.f32 %v2326_v6, 0.0  ;;  %v2622_v11 = vmax.f32 %v2367_v7, 0.0 }
 0x21c   :  { %v2328_v14 = vpop.f32.mrf.mxu0  ;;  %v2369_v15 = vpop.f32.mrf.mxu1 }
 0x21d   :  { %2677 = vst [vmem:[#allocation6 + $0x148] sm:$0xff] %v2620_v10  ;;  %2679 = vst [vmem:[#allocation6 + $0x158] sm:$0xff] %v2622_v11 }
 0x21e   :  { %v2405_v18 = vpop.f32.mrf.mxu0  ;;  %v2446_v19 = vpop.f32.mrf.mxu1 }
 0x21f   :  { %v2406_v20 = vadd.f32 %v2405_v18, %v722_v12  ;;  %v2447_v21 = vadd.f32 %v2446_v19, %v730_v13 }
 0x220   :  { %v2407_v22 = vpop.f32.mrf.mxu0  ;;  %v2448_v23 = vpop.f32.mrf.mxu1 }
 0x221   :  { %v2623_v24 = vmax.f32 %v2406_v20, 0.0  ;;  %v2625_v25 = vmax.f32 %v2447_v21, 0.0  ;;  %v2408_v26 = vadd.f32 %v2407_v22, %v726_v16  ;;  %v2449_v46 = vadd.f32 %v2448_v23, %v734_v17 }
 0x222   :  { %v2409_v27 = vpop.f32.mrf.mxu0  ;;  %v2450_v47 = vpop.f32.mrf.mxu1 }
 0x223   :  { %2680 = vst [vmem:[#allocation6 + $0x160] sm:$0xff] %v2623_v24  ;;  %2682 = vst [vmem:[#allocation6 + $0x170] sm:$0xff] %v2625_v25  ;;  %v2624_v28 = vmax.f32 %v2408_v26, 0.0  ;;  %v2626_v29 = vmax.f32 %v2449_v46, 0.0 }
 0x224   :  { %v2410_v30 = vpop.f32.mrf.mxu0  ;;  %v2451_v31 = vpop.f32.mrf.mxu1 }
 0x225   :  { %2681 = vst [vmem:[#allocation6 + $0x168] sm:$0xff] %v2624_v28  ;;  %2683 = vst [vmem:[#allocation6 + $0x178] sm:$0xff] %v2626_v29 }
 0x226   :  { %v2487_v34 = vpop.f32.mrf.mxu0  ;;  %v2528_v35 = vpop.f32.mrf.mxu1 }
 0x227   :  { %v2488_v36 = vadd.f32 %v2487_v34, %v738_v50  ;;  %v2529_v37 = vadd.f32 %v2528_v35, %v746_v51 }
 0x228   :  { %v2489_v38 = vpop.f32.mrf.mxu0  ;;  %v2530_v39 = vpop.f32.mrf.mxu1 }
 0x229   :  { %v2627_v40 = vmax.f32 %v2488_v36, 0.0  ;;  %v2629_v41 = vmax.f32 %v2529_v37, 0.0  ;;  %v2490_v42 = vadd.f32 %v2489_v38, %v742_v32  ;;  %v2531_v59 = vadd.f32 %v2530_v39, %v750_v33 }
 0x22a   :  { %v2491_v43 = vpop.f32.mrf.mxu0  ;;  %v2532_v60 = vpop.f32.mrf.mxu1 }
 0x22b   :  { %2684 = vst [vmem:[#allocation6 + $0x180] sm:$0xff] %v2627_v40  ;;  %2686 = vst [vmem:[#allocation6 + $0x190] sm:$0xff] %v2629_v41  ;;  %v2628_v44 = vmax.f32 %v2490_v42, 0.0  ;;  %v2630_v49 = vmax.f32 %v2531_v59, 0.0 }
 0x22c   :  { %v2492_v45 = vpop.f32.mrf.mxu0  ;;  %v2533_v63 = vpop.f32.mrf.mxu1 }
 0x22d   :  { %2685 = vst [vmem:[#allocation6 + $0x188] sm:$0xff] %v2628_v44  ;;  %2687 = vst [vmem:[#allocation6 + $0x198] sm:$0xff] %v2630_v49 }
 0x22e   :  { %v2569_v48 = vpop.f32.mrf.mxu0 }
 0x22f   :  { %v2570_v52 = vadd.f32 %v2764_v0, %v2569_v48 }
 0x230   :  { %v2961_v53 = vpop.f32.mrf.mxu0 }
 0x231   :  { %v2631_v3 = vmax.f32 %v2570_v52, 0.0 }
 0x232   :  { %v2572_v54 = vpop.f32.mrf.mxu0 }
 0x233   :  { %2688 = vst [vmem:[#allocation6 + $0x1a0] sm:$0xff] %v2631_v3 }
 0x234   :  { %v2962_v55 = vpop.f32.mrf.mxu0 }
 0x235   :  { %3225 = shalt.err (!%p3222_p0)
}
 0x236   :  { %2708 = dma.vmem_to_hbm [thread:$0]  %s2706_s27, 6784, %s3623_s6, [#allocation7]  }
 0x237   :  { %s3234_s1 = scalar_lea.vmem %s2716_s29, 128  ;;  %p3239_p2 = scmp.lt.s32.totalorder %s2716_s29, %s2716_s29 }
 0x238   :  { %p3235_p1 = scmp.ne.s32.totalorder %s2716_s29, %s3234_s1  ;;  %p3240_p3 = scmp.lt.s32.totalorder %s3234_s1, %s3234_s1 }
 0x23a   :  { %p3241_p4 = por %p3240_p3, %p3239_p2 }
 0x23c   :  { %p3242_p5 = pnand %p3241_p4, %p3235_p1 }
 0x23e   :  { %3245 = shalt.err (!%p3242_p5)
}
 0x23f   :  { %2718 = dma.vmem_to_hbm [thread:$0]  %s2716_s29, 128, %s3624_s7, [#allocation7]  }
 0x240   :  { %3256 = dma.done.wait [#allocation4], 512  }
 0x241   :  { %3257 = vsyncadd [#allocation4], 4294966784 }
 0x242   :  { %3258 = dma.done.wait [#allocation7], 6912  }
 0x243   :  { %3259 = vsyncadd [#allocation7], 4294960384 }
 0x244   :  { %2728 = vsyncpa [#allocation3], 1 }
 0x245   :  { %2729 = vsyncpa [#allocation4], 1 }
 0x246   :  { %2730 = vsyncpa [#allocation7], 1 }

</bundles_post_ra>
